<compile_context>
chip_gen: v6e
topology: v6e:2x2x1
jax: 0.10.0
libtpu: 0.0.40
codegen_flags: <defaults>
</compile_context>

<pallas_src>
import functools

import jax
import jax.numpy as jnp
import numpy as np
from jax.experimental import pallas as pl
from jax.experimental.pallas import tpu as pltpu

_ALIGN = 16  # bf16 sublane packing (16,128): keep every slab section tile-aligned.


def _round_up(n, m):
    return ((n + m - 1) // m) * m


def _param_layout(input_dim, hidden_dim, output_dim):
    # Row-aligned sections inside one packed bf16 slab -> zero-cost static ref
    # slices inside the kernel, one HBM->VMEM copy per call.
    #   rows [off_w1t, +hidden)  cols [0, input_dim)  : W1^T   [hidden, in]
    #   rows [off_b1,  +hidden)  col  0               : b1     [hidden, 1]
    #   rows [off_w2t, +output)  cols [0, hidden)     : W2^T   [out, hidden]
    #   rows [off_b2,  +output)  col  0               : b2     [out, 1]
    off_w1t = 0
    off_b1 = _round_up(hidden_dim, _ALIGN)
    off_w2t = off_b1 + _round_up(hidden_dim, _ALIGN)
    off_b2 = off_w2t + _round_up(output_dim, _ALIGN)
    rows = off_b2 + _round_up(output_dim, _ALIGN)
    cols = max(input_dim, hidden_dim)
    return off_w1t, off_b1, off_w2t, off_b2, rows, cols


def pack_params(w1, b1, w2, b2, dtype=jnp.bfloat16):
    # w1: [input_dim, hidden], b1: [hidden], w2: [hidden, output], b2: [output]
    # (math layout: y = relu(x @ w1 + b1) @ w2 + b2); stored transposed so the
    # kernel computes W^T @ x^T with the batch on lanes.
    input_dim, hidden_dim = w1.shape
    output_dim = w2.shape[1]
    off_w1t, off_b1, off_w2t, off_b2, rows, cols = _param_layout(
        input_dim, hidden_dim, output_dim)
    p = jnp.zeros((rows, cols), dtype)
    p = p.at[off_w1t:off_w1t + hidden_dim, :input_dim].set(w1.T.astype(dtype))
    p = p.at[off_b1:off_b1 + hidden_dim, 0].set(jnp.reshape(b1, (-1,)).astype(dtype))
    p = p.at[off_w2t:off_w2t + output_dim, :hidden_dim].set(w2.T.astype(dtype))
    p = p.at[off_b2:off_b2 + output_dim, 0].set(jnp.reshape(b2, (-1,)).astype(dtype))
    return p


def dqn_mlp_kernel(xt_ref, p_ref, ot_ref, *, input_dim, hidden_dim, output_dim):
    off_w1t, off_b1, off_w2t, off_b2, _, _ = _param_layout(
        input_dim, hidden_dim, output_dim)
    # Static, tile-aligned ref slices: only the needed rows are loaded, no
    # relayout of a big loaded slab.
    w1t = p_ref[off_w1t:off_w1t + hidden_dim, :input_dim]    # [H, in]   bf16
    b1 = p_ref[off_b1:off_b1 + hidden_dim, 0:1]              # [H, 1]    bf16
    w2t = p_ref[off_w2t:off_w2t + output_dim, :hidden_dim]   # [out, H]  bf16
    b2 = p_ref[off_b2:off_b2 + output_dim, 0:1]              # [out, 1]  bf16

    xt = xt_ref[...]                                         # [in, tb]  bf16

    # Layer 1: lane-dense [H, tb] result, bf16 MXU inputs, f32 accumulation.
    h = jnp.dot(w1t, xt, preferred_element_type=jnp.float32)
    h = jnp.maximum(h + b1.astype(jnp.float32), 0.0)         # bias+ReLU in f32
    # Layer 2: re-quantize activations to bf16 (single-pass MXU), f32 accum.
    o = jnp.dot(w2t, h.astype(jnp.bfloat16), preferred_element_type=jnp.float32)
    ot_ref[...] = o + b2.astype(jnp.float32)                 # lane-dense store
    # TODO(synk): on v5e, if profiling shows the (K=4) first matmul's MRF pop
    # on the critical path, reformulate layer 1 as 4 broadcast multiply-adds.


def dqn_forward(x, packed_params, *, input_dim, hidden_dim, output_dim,
                tile_b=2048, min_grid_steps=2):
    orig_lead = x.shape[:-1]
    x2 = x.reshape(-1, input_dim)
    B = x2.shape[0]

    # Batch on lanes: pad to a multiple of 128, then pick balanced lane-aligned
    # tiles so padding never exceeds one tile, and keep >=2 "parallel" steps
    # when the batch allows it (feeds both TensorCores on v7x).
    b128 = max(_round_up(B, 128), 128)
    num_tiles = pl.cdiv(b128, tile_b)
    if b128 >= 2 * 128:
        num_tiles = max(num_tiles, min(min_grid_steps, b128 // 128))
    tb = _round_up(pl.cdiv(b128, num_tiles), 128)
    b_pad = num_tiles * tb

    # One-time layout plumbing: [B, in] f32 -> [in, B_pad] bf16.
    xt = jnp.transpose(x2).astype(jnp.bfloat16)
    if b_pad != B:
        xt = jnp.pad(xt, ((0, 0), (0, b_pad - B)))

    kernel = functools.partial(
        dqn_mlp_kernel, input_dim=input_dim, hidden_dim=hidden_dim,
        output_dim=output_dim)

    flops = 2 * b_pad * (input_dim * hidden_dim + hidden_dim * output_dim)
    bytes_accessed = (2 * b_pad * input_dim                       # bf16 x
                      + 2 * int(np.prod(packed_params.shape))     # bf16 params
                      + 4 * b_pad * output_dim)                   # f32 out

    out_t = pl.pallas_call(
        kernel,
        out_shape=jax.ShapeDtypeStruct((output_dim, b_pad), jnp.float32),
        grid_spec=pltpu.PrefetchScalarGridSpec(
            num_scalar_prefetch=0,
            grid=(num_tiles,),
            in_specs=[
                # x tile: lane-dense, double-buffered over the batch grid.
                pl.BlockSpec((input_dim, tb), lambda i: (0, i)),
                # packed params: same block every step -> VMEM resident.
                # TODO(synk): pipeline_mode=pl.Buffered(1) would drop the
                # unused second buffer; omitted to stay on the safest lowering
                # path (saving is a few KiB only).
                pl.BlockSpec(packed_params.shape, lambda i: (0, 0)),
            ],
            out_specs=pl.BlockSpec((output_dim, tb), lambda i: (0, i)),
        ),
        compiler_params=pltpu.CompilerParams(
            dimension_semantics=("parallel",)),
        cost_estimate=pl.CostEstimate(
            flops=flops, transcendentals=0, bytes_accessed=bytes_accessed),
    )(xt, packed_params)

    out = jnp.transpose(out_t[:, :B])            # [B, output_dim] f32
    return out.reshape(orig_lead + (output_dim,))


def init_params(key, input_dim, hidden_dim, output_dim):
    # Deterministic init mimicking PyTorch nn.Linear default:
    # U(-1/sqrt(fan_in), 1/sqrt(fan_in)) for both weights and biases.
    k1, k2, k3, k4 = jax.random.split(key, 4)
    bound1 = 1.0 / np.sqrt(input_dim)
    bound2 = 1.0 / np.sqrt(hidden_dim)
    w1 = jax.random.uniform(k1, (input_dim, hidden_dim), jnp.float32, -bound1, bound1)
    b1 = jax.random.uniform(k2, (hidden_dim,), jnp.float32, -bound1, bound1)
    w2 = jax.random.uniform(k3, (hidden_dim, output_dim), jnp.float32, -bound2, bound2)
    b2 = jax.random.uniform(k4, (output_dim,), jnp.float32, -bound2, bound2)
    return w1, b1, w2, b2


def _reference(x, w1, b1, w2, b2):
    # Mirrors the kernel numerics: bf16 storage of x / params, f32 accumulation,
    # bf16 re-quantization of the hidden activations before layer 2.
    q = lambda a: a.astype(jnp.bfloat16).astype(jnp.float32)
    h = jnp.maximum(q(x) @ q(w1) + q(b1), 0.0)
    return q(h) @ q(w2) + q(b2)


if __name__ == "__main__":
    # DQNetwork(input_dim=4, output_dim=2): Linear(4,32) -> ReLU -> Linear(32,2).
    input_dim, hidden_dim, output_dim = 4, 32, 2

    key = jax.random.PRNGKey(0)
    kx, kp, kx2 = jax.random.split(key, 3)
    w1, b1, w2, b2 = init_params(kp, input_dim, hidden_dim, output_dim)
    params = pack_params(w1, b1, w2, b2)

    # Tolerance note: kernel and reference use identical bf16-rounded inputs
    # with f32 accumulation; 5e-3 absorbs rare bf16 rounding-boundary flips of
    # hidden activations caused by f32 summation-order differences.
    TOL = 5e-3

    # Small batch: single grid step, whole problem in VMEM.
    x_small = jax.random.normal(kx, (8, input_dim), jnp.float32)
    out_small = jax.block_until_ready(
        dqn_forward(x_small, params, input_dim=input_dim,
                    hidden_dim=hidden_dim, output_dim=output_dim))
    np.testing.assert_allclose(
        np.asarray(out_small), np.asarray(_reference(x_small, w1, b1, w2, b2)),
        rtol=TOL, atol=TOL)

    # Larger batch exercising the batch grid + padding path
    # (B=1000 -> 1024 lanes, 2 parallel tiles of 512; padding < one tile).
    x_big = jax.random.normal(kx2, (1000, input_dim), jnp.float32)
    out_big = jax.block_until_ready(
        dqn_forward(x_big, params, input_dim=input_dim,
                    hidden_dim=hidden_dim, output_dim=output_dim))
    np.testing.assert_allclose(
        np.asarray(out_big), np.asarray(_reference(x_big, w1, b1, w2, b2)),
        rtol=TOL, atol=TOL)

    print("KERNEL_OK")
</pallas_src>

<mosaic_0001>
module attributes {stable_mosaic.version = 11 : i64} {
  func.func @dqn_mlp_kernel(%arg0: i32, %arg1: memref<4x128xbf16, #tpu.memory_space<vmem>>, %arg2: memref<96x32xbf16, #tpu.memory_space<vmem>>, %arg3: memref<2x128xf32, #tpu.memory_space<vmem>>) attributes {dimension_semantics = [#tpu.dimension_semantics<parallel>], iteration_bounds = array<i64: 1>, scalar_prefetch = 0 : i64, scratch_operands = 0 : i64, tpu.core_type = #tpu.core_type<tc>, window_params = [{transform_indices = @transform_0, window_bounds = array<i64: 4, 128>}, {pipeline_mode = #tpu.pipeline_mode<synchronous>, transform_indices = @transform_1, window_bounds = array<i64: 96, 32>}, {transform_indices = @transform_2, window_bounds = array<i64: 2, 128>}]} {
    %c0 = arith.constant 0 : index
    %c0_0 = arith.constant 0 : index
    %0 = vector.load %arg2[%c0, %c0_0] : memref<96x32xbf16, #tpu.memory_space<vmem>>, vector<32x4xbf16>
    %c32 = arith.constant 32 : index
    %c0_1 = arith.constant 0 : index
    %1 = vector.load %arg2[%c32, %c0_1] : memref<96x32xbf16, #tpu.memory_space<vmem>>, vector<32x1xbf16>
    %c64 = arith.constant 64 : index
    %c0_2 = arith.constant 0 : index
    %2 = vector.load %arg2[%c64, %c0_2] : memref<96x32xbf16, #tpu.memory_space<vmem>>, vector<2x32xbf16>
    %c80 = arith.constant 80 : index
    %c0_3 = arith.constant 0 : index
    %3 = vector.load %arg2[%c80, %c0_3] : memref<96x32xbf16, #tpu.memory_space<vmem>>, vector<2x1xbf16>
    %c0_4 = arith.constant 0 : index
    %c0_5 = arith.constant 0 : index
    %4 = vector.load %arg1[%c0_4, %c0_5] : memref<4x128xbf16, #tpu.memory_space<vmem>>, vector<4x128xbf16>
    %cst = arith.constant dense<0.000000e+00> : vector<32x128xf32>
    %5 = tpu.matmul %0, %4, %cst {dimension_numbers = #tpu.dot_dimension_numbers<[1], [0], [0], [1], [0, 0, 1, 1], [], []>} : vector<32x4xbf16>, vector<4x128xbf16>, vector<32x128xf32> -> vector<32x128xf32>
    %6 = arith.extf %1 : vector<32x1xbf16> to vector<32x1xf32>
    %7 = vector.broadcast %6 : vector<32x1xf32> to vector<32x128xf32>
    %8 = arith.addf %5, %7 : vector<32x128xf32>
    %cst_6 = arith.constant 0.000000e+00 : f32
    %9 = vector.broadcast %cst_6 : f32 to vector<32x128xf32>
    %10 = arith.maximumf %8, %9 : vector<32x128xf32>
    %11 = arith.truncf %10 : vector<32x128xf32> to vector<32x128xbf16>
    %cst_7 = arith.constant dense<0.000000e+00> : vector<2x128xf32>
    %12 = tpu.matmul %2, %11, %cst_7 {dimension_numbers = #tpu.dot_dimension_numbers<[1], [0], [0], [1], [0, 0, 1, 1], [], []>} : vector<2x32xbf16>, vector<32x128xbf16>, vector<2x128xf32> -> vector<2x128xf32>
    %13 = arith.extf %3 : vector<2x1xbf16> to vector<2x1xf32>
    %14 = vector.broadcast %13 : vector<2x1xf32> to vector<2x128xf32>
    %15 = arith.addf %12, %14 : vector<2x128xf32>
    %c0_8 = arith.constant 0 : index
    %c0_9 = arith.constant 0 : index
    %16 = vector.load %arg3[%c0_8, %c0_9] : memref<2x128xf32, #tpu.memory_space<vmem>>, vector<2x128xf32>
    tpu.vector_store %arg3[%c0_8, %c0_9], %15 {strides = array<i32>} : memref<2x128xf32, #tpu.memory_space<vmem>>, vector<2x128xf32>,
    return
  }
  func.func @transform_0(%arg0: i32) -> (i32, i32) {
    %c0_i32 = arith.constant 0 : i32
    %c0_i32_0 = arith.constant 0 : i32
    return %c0_i32, %arg0 : i32, i32
  }
  func.func @transform_1(%arg0: i32) -> (i32, i32) {
    %c0_i32 = arith.constant 0 : i32
    %c0_i32_0 = arith.constant 0 : i32
    %c0_i32_1 = arith.constant 0 : i32
    return %c0_i32, %c0_i32_0 : i32, i32
  }
  func.func @transform_2(%arg0: i32) -> (i32, i32) {
    %c0_i32 = arith.constant 0 : i32
    %c0_i32_0 = arith.constant 0 : i32
    return %c0_i32, %arg0 : i32, i32
  }
}

</mosaic_0001>

<bundles_post_ra>
// kernel: tpu_custom_call.1
= control target key start
LH: loop header
LB: loop body
LE: loop exit
PB: predicated region body
PF: predicated region fallthrough
CT: control target
= control target key end

     0   :  { %vm65_vm0 = vcmask 1041408   ;;  %vm58_vm1 = vcmask 31744   ;;  %v269_v5 = vmov 0   ;;  %s312_s0 = inlined_call_operand.vmem [shape: bf16[4,128], index: 0, kind: input, shape index: {}]   ;;  %s313_s1 = inlined_call_operand.vmem [shape: bf16[96,32], index: 1, kind: input, shape index: {}]   ;;  %s314_s2 = inlined_call_operand.hbm [shape: f32[2,128], index: 2, kind: output, shape index: {}]  }
   0x1   :  { %v23_v0 = vld [vmem:[%s312_s0] sm:$0x3]  ;;  %v242_v3 = vld [vmem:[%s313_s1 + $0x8] sm:$0xff]   ;;  %v203_v4 = vld [vmem:[%s313_s1 + $0x18] sm:$0xff]   ;;  %229 = vset.pattern.permute.xlu0 %v269_v5  ;;  %240 = vset.pattern.permute.xlu1 %v269_v5 }
   0x2   :  { %v241_v1 = vld [vmem:[%s313_s1] sm:$0xff]   ;;  %224 = vmatprep.subr.msk.bf16.mxu0 %vm65_vm0, %v23_v0  ;;  %v67_v2 = vsel %vm65_vm0, %v23_v0, 0  ;;  %v200_v6 = vunpack.c.l.bf16 %v203_v4  ;;  %v201_v7 = vunpack.c.h.bf16 %v203_v4  ;;  %v202_v8 = vld [vmem:[%s313_s1 + $0x10] sm:$0xff]  }
   0x3   :  { %211 = vmatpush3.bf16.msra.mxu0 %v67_v2  ;;  %212 = vmatprep.mubr.msk.bf16.mxu0 %vm58_vm1, %v241_v1 }
   0x4   :  { %7 = vsyncpa [#allocation3], 0  ;;  %v196_v9 = vunpack.c.l.bf16 %v202_v8  ;;  %v197_v10 = vunpack.c.h.bf16 %v202_v8  ;;  %v230_v11 = vpack.i.bf16 %v201_v7, %v200_v6  ;;  %v270_v13 = vmov 0.0   ;;  %v22_v14 = vld [vmem:[%s313_s1 + $0x28] sm:$0x1]  ;;  %s272_s22 = smov [#allocation2]  }
   0x5   :  { %216 = vmatprep.subr.bf16.mxu1 %v270_v13  ;;  %vm271_vm2 = vmmov 0   ;;  %v124_v15 = vunpack.c.l.bf16 %v22_v14  ;;  %v21_v32 = vld [vmem:[%s313_s1 + $0x20] sm:$0x1]  ;;  %vm130_vm3 = vcmask 261120   ;;  %s181_s23 = sshll.u32 %s272_s22, 4  ;;  %s182_s23 = int_to_ptr.vmem [resolvable:$true] %s181_s23 }
   0x6   :  { %213 = vmatmul.mubr.msk.bf16.vlgmr.msra.gmra.mxu0 %vm58_vm1, %v242_v3  ;;  %231 = vperm.xlu0 %229, %v230_v11   ;;  %v235_v12 = vpack.i.bf16 %v197_v10, %v196_v9  ;;  %s247_s24 = scalar_lea.vmem %s182_s23, 32  ;;  %p252_p1 = scmp.lt.s32.totalorder %s182_s23, %s182_s23 }
   0x7   :  { %220 = vmatprep.mubr.msk.bf16.mxu1 %vm271_vm2, %v270_v13  ;;  %127 = vperm.xlu1 %240, %v124_v15   ;;  %p248_p0 = scmp.ne.s32.totalorder %s182_s23, %s247_s24  ;;  %p253_p2 = scmp.lt.s32.totalorder %s247_s24, %s247_s24 }
   0x9   :  { %p254_p3 = por %p253_p2, %p252_p1 }
   0xa   :  { %236 = vperm.xlu0 %229, %v235_v12  }
   0xb   :  { %p255_p4 = pnand %p254_p3, %p248_p0 }
  0x81   :  { %v232_v16 = vpop.permute.xlu0 %231 }
  0x82   :  { %v128_v33 = vpop.permute.xlu1 %127 }
  0x85   :  { %v237_v17 = vpop.permute.xlu0 %236 }
  0xc6   :  { %v214_v18 = vpop.f32.mrf.mxu0 }
  0xc7   :  { %v243_v20 = vadd.low.f32.bf16 %v214_v18, %v232_v16 }
  0xc8   :  { %v103_v19 = vpop.f32.mrf.mxu0 }
  0xc9   :  { %v120_v24 = vmax.f32 %v243_v20, 0.0  ;;  %v245_v25 = vadd.low.f32.bf16 %v103_v19, %v237_v17 }
  0xca   :  { %v215_v21 = vpop.f32.mrf.mxu0 }
  0xcb   :  { %v244_v22 = vadd.high.f32.bf16 %v215_v21, %v232_v16  ;;  %v118_v30 = vmax.f32 %v245_v25, 0.0 }
  0xcc   :  { %v106_v23 = vpop.f32.mrf.mxu0 }
  0xcd   :  { %v121_v26 = vmax.f32 %v244_v22, 0.0  ;;  %v246_v27 = vadd.high.f32.bf16 %v106_v23, %v237_v17 }
  0xcf   :  { %v119_v28 = vmax.f32 %v246_v27, 0.0  ;;  %v123_v29 = vpack.c.bf16 %v121_v26, %v120_v24 }
  0xd1   :  { %217 = vmatpush3.bf16.msra.mxu1 %v123_v29  ;;  %v122_v31 = vpack.c.bf16 %v119_v28, %v118_v30 }
  0xd2   :  { %218 = vmatprep.subr.bf16.mxu1 %v270_v13 }
  0xd5   :  { %219 = vmatpush3.bf16.msra.mxu1 %v122_v31 }
  0xd8   :  { %221 = vmatmul.mubr.msk.bf16.vlgmr.msra.gmra.mxu1 %vm130_vm3, %v21_v32 }
 0x198   :  { %v168_v34 = vpop.f32.mrf.mxu1 }
 0x199   :  { %v169_v35 = vadd.f32 %v168_v34, %v128_v33 }
 0x19a   :  { %v222_v36 = vpop.f32.mrf.mxu1 }
 0x19b   :  { %174 = vst [vmem:[#allocation2] sm:$0x3] %v169_v35 }
 0x19c   :  { %v171_v37 = vpop.f32.mrf.mxu1 }
 0x19d   :  { %258 = shalt.err (!%p255_p4)
}
 0x19e   :  { %184 = dma.vmem_to_hbm [thread:$0]  %s182_s23, 32, %s314_s2, [#allocation3]   ;;  %v223_v38 = vpop.f32.mrf.mxu1 }
 0x19f   :  { %267 = dma.done.wait [#allocation3], 32  }
 0x1a0   :  { %268 = vsyncadd [#allocation3], 4294967264 }
 0x1a1   :  { %188 = vsyncpa [#allocation3], 1 }

</bundles_post_ra>
